<compile_context>
chip_gen: v5e
topology: v5e:2x2
jax: 0.10.0
libtpu: 0.0.40
codegen_flags: <defaults>
</compile_context>

<pallas_src>
import math
import functools

import jax
import jax.numpy as jnp
from jax.experimental import pallas as pl
from jax.experimental.pallas import tpu as pltpu


def _mha_kernel(q_ref, k_ref, v_ref,
                wq_ref, bq_ref, wk_ref, bk_ref, wv_ref, bv_ref,
                wo_ref, bo_ref,
                o_ref, acc_ref, *, scale):
    # q/k/v_ref: (bb, S, D) bf16 blocks (resident across the head axis)
    # wq/wk/wv_ref: (1, D, d_k) bf16 per-head projection weights
    # bq/bk/bv_ref: (1, 1, d_k) f32 per-head biases
    # wo_ref: (1, d_k, D) bf16 per-head slice of the output projection
    # bo_ref: (1, D) f32; o_ref: (bb, S, D) f32; acc_ref: (bb, S, D) f32 scratch
    h = pl.program_id(1)
    bb, S, D = q_ref.shape
    d_k = wq_ref.shape[-1]

    # Flatten (batch_block, seq) so the projections are single big-M 2D matmuls.
    q2 = q_ref[...].reshape(bb * S, D)
    k2 = k_ref[...].reshape(bb * S, D)
    v2 = v_ref[...].reshape(bb * S, D)

    # Per-head projections on the MXU (bf16 inputs, f32 accumulation).
    qh = jnp.dot(q2, wq_ref[0], preferred_element_type=jnp.float32) + bq_ref[0]
    kh = jnp.dot(k2, wk_ref[0], preferred_element_type=jnp.float32) + bk_ref[0]
    vh = jnp.dot(v2, wv_ref[0], preferred_element_type=jnp.float32) + bv_ref[0]

    # Fold 1/sqrt(d_k) into Q (O(S*d_k) VPU work instead of O(S*S) on scores).
    qh = qh * scale

    qh3 = qh.reshape(bb, S, d_k).astype(jnp.bfloat16)
    kh3 = kh.reshape(bb, S, d_k).astype(jnp.bfloat16)
    vh3 = vh.reshape(bb, S, d_k).astype(jnp.bfloat16)

    # Scaled dot-product attention for this head; softmax stats kept in f32.
    s = jnp.einsum('bqd,bkd->bqk', qh3, kh3,
                   preferred_element_type=jnp.float32)            # (bb, S, S)
    m = jnp.max(s, axis=-1, keepdims=True)
    e = jnp.exp(s - m)
    l = jnp.sum(e, axis=-1, keepdims=True)
    p = e * pl.reciprocal(l, approx=True)                         # softmax on EUP recip

    ctx = jnp.einsum('bqk,bkd->bqd', p.astype(jnp.bfloat16), vh3,
                     preferred_element_type=jnp.float32)          # (bb, S, d_k)

    # Fused output projection for this head, accumulated across heads
    # (replaces head-concat + one big final matmul).
    part = jnp.dot(ctx.reshape(bb * S, d_k).astype(jnp.bfloat16), wo_ref[0],
                   preferred_element_type=jnp.float32).reshape(bb, S, D)

    @pl.when(h == 0)
    def _():
        acc_ref[...] = jnp.zeros_like(acc_ref)

    acc_ref[...] += part

    @pl.when(h == pl.num_programs(1) - 1)
    def _():
        o_ref[...] = (acc_ref[...] + bo_ref[...]).astype(o_ref.dtype)


def multi_headed_attention(query, key, value, params, n_heads, *, block_b=1):
    """query/key/value: (B, S, D) float32.  params: dict with (in, out) weights."""
    B, S, D = query.shape
    assert D % n_heads == 0
    d_k = D // n_heads
    assert B % block_b == 0, "block_b must divide the batch size"

    f32, bf16 = jnp.float32, jnp.bfloat16

    # Head-major weight layouts so per-head slicing is done by BlockSpec along
    # layout-friendly (non-lane) axes:
    #   wq/wk/wv: (H, D, d_k)   -- wq_h[h] == wq[:, h*d_k:(h+1)*d_k]
    #   wo:       (H, d_k, D)   -- wo_h[h] == wo[h*d_k:(h+1)*d_k, :]
    wq_h = params["wq"].reshape(D, n_heads, d_k).transpose(1, 0, 2).astype(bf16)
    wk_h = params["wk"].reshape(D, n_heads, d_k).transpose(1, 0, 2).astype(bf16)
    wv_h = params["wv"].reshape(D, n_heads, d_k).transpose(1, 0, 2).astype(bf16)
    wo_h = params["wo"].reshape(n_heads, d_k, D).astype(bf16)

    bq_h = params["bq"].reshape(n_heads, 1, d_k).astype(f32)
    bk_h = params["bk"].reshape(n_heads, 1, d_k).astype(f32)
    bv_h = params["bv"].reshape(n_heads, 1, d_k).astype(f32)
    bo = params["bo"].reshape(1, D).astype(f32)

    # bf16 activations into the kernel: halves input HBM traffic / VMEM,
    # MXU runs natively in bf16 with f32 accumulation.
    q_bf = query.astype(bf16)
    k_bf = key.astype(bf16)
    v_bf = value.astype(bf16)

    grid = (B // block_b, n_heads)  # head axis = reduction -> last, "arbitrary"

    qkv_spec = pl.BlockSpec((block_b, S, D), lambda b, h: (b, 0, 0))
    w_in_spec = pl.BlockSpec((1, D, d_k), lambda b, h: (h, 0, 0))
    b_in_spec = pl.BlockSpec((1, 1, d_k), lambda b, h: (h, 0, 0))
    wo_spec = pl.BlockSpec((1, d_k, D), lambda b, h: (h, 0, 0))
    bo_spec = pl.BlockSpec((1, D), lambda b, h: (0, 0))
    out_spec = pl.BlockSpec((block_b, S, D), lambda b, h: (b, 0, 0))

    # Explicit VMEM budget (double-buffered blocks + scratch + scores), with
    # headroom, clamped to a value safe on v5e/v6e (128 MiB) and v7x (64 MiB).
    blk = block_b * S * D
    budget = (3 * 2 * blk * 2          # q,k,v bf16, double buffered
              + 2 * blk * 4            # output f32, double buffered
              + blk * 4                # f32 accumulator scratch
              + 2 * (3 * D * d_k + d_k * D) * 2   # per-head weights, bf16, x2 buffers
              + 2 * (3 * d_k + D) * 4             # biases
              + 4 * block_b * S * S * 4)          # scores/exp/p intermediates
    vmem_limit = int(min(64 * 1024 * 1024, max(32 * 1024 * 1024, 2 * budget)))

    kernel = functools.partial(_mha_kernel, scale=1.0 / math.sqrt(d_k))

    return pl.pallas_call(
        kernel,
        out_shape=jax.ShapeDtypeStruct((B, S, D), query.dtype),
        grid_spec=pltpu.PrefetchScalarGridSpec(
            num_scalar_prefetch=0,
            grid=grid,
            in_specs=[qkv_spec, qkv_spec, qkv_spec,
                      w_in_spec, b_in_spec,
                      w_in_spec, b_in_spec,
                      w_in_spec, b_in_spec,
                      wo_spec, bo_spec],
            out_specs=out_spec,
            scratch_shapes=[pltpu.VMEM((block_b, S, D), jnp.float32)],
        ),
        compiler_params=pltpu.CompilerParams(
            dimension_semantics=("parallel", "arbitrary"),
            vmem_limit_bytes=vmem_limit),
    )(q_bf, k_bf, v_bf, wq_h, bq_h, wk_h, bk_h, wv_h, bv_h, wo_h, bo)


def _reference(query, key, value, params, n_heads):
    """Pure-JAX f32 reference mirroring the PyTorch forward (eval-mode dropout)."""
    B, S, D = query.shape
    d_k = D // n_heads

    def lin(x, w, b):
        return x @ w + b

    def split_heads(x):  # (B, S, D) -> (B, H, S, d_k)
        return x.reshape(B, S, n_heads, d_k).transpose(0, 2, 1, 3)

    q = split_heads(lin(query, params["wq"], params["bq"]))
    k = split_heads(lin(key, params["wk"], params["bk"]))
    v = split_heads(lin(value, params["wv"], params["bv"]))

    scores = jnp.einsum("bhqd,bhkd->bhqk", q, k) / math.sqrt(d_k)
    p = jax.nn.softmax(scores, axis=-1)
    x = jnp.einsum("bhqk,bhkd->bhqd", p, v)
    x = x.transpose(0, 2, 1, 3).reshape(B, S, D)
    return lin(x, params["wo"], params["bo"])


if __name__ == "__main__":
    B, S, D, H = 2, 8, 32, 4  # batch, seq, d_model, heads (d_k = 8)

    key0 = jax.random.PRNGKey(0)
    ks = jax.random.split(key0, 11)

    # Deterministic synthetic parameter init (weights stored as (in, out)).
    scale = 1.0 / math.sqrt(D)
    params = {
        "wq": jax.random.uniform(ks[0], (D, D), jnp.float32, -scale, scale),
        "bq": jax.random.uniform(ks[1], (D,), jnp.float32, -scale, scale),
        "wk": jax.random.uniform(ks[2], (D, D), jnp.float32, -scale, scale),
        "bk": jax.random.uniform(ks[3], (D,), jnp.float32, -scale, scale),
        "wv": jax.random.uniform(ks[4], (D, D), jnp.float32, -scale, scale),
        "bv": jax.random.uniform(ks[5], (D,), jnp.float32, -scale, scale),
        "wo": jax.random.uniform(ks[6], (D, D), jnp.float32, -scale, scale),
        "bo": jax.random.uniform(ks[7], (D,), jnp.float32, -scale, scale),
    }

    query = jax.random.normal(ks[8], (B, S, D), jnp.float32)
    key_in = jax.random.normal(ks[9], (B, S, D), jnp.float32)
    value = jax.random.normal(ks[10], (B, S, D), jnp.float32)

    out = multi_headed_attention(query, key_in, value, params, H, block_b=1)
    out = jax.block_until_ready(out)

    ref = _reference(query, key_in, value, params, H)
    assert out.shape == (B, S, D)
    # bf16 MXU inputs (f32 accumulation) + approx reciprocal -> loosened tolerance.
    assert jnp.allclose(out, ref, atol=5e-2, rtol=5e-2), "mismatch vs reference"

    print("KERNEL_OK")
</pallas_src>

<mosaic_0001>
module attributes {stable_mosaic.version = 11 : i64} {
  func.func @_mha_kernel(%arg0: i32, %arg1: i32, %arg2: memref<1x8x32xbf16, #tpu.memory_space<vmem>>, %arg3: memref<1x8x32xbf16, #tpu.memory_space<vmem>>, %arg4: memref<1x8x32xbf16, #tpu.memory_space<vmem>>, %arg5: memref<1x32x8xbf16, #tpu.memory_space<vmem>>, %arg6: memref<1x1x8xf32, #tpu.memory_space<vmem>>, %arg7: memref<1x32x8xbf16, #tpu.memory_space<vmem>>, %arg8: memref<1x1x8xf32, #tpu.memory_space<vmem>>, %arg9: memref<1x32x8xbf16, #tpu.memory_space<vmem>>, %arg10: memref<1x1x8xf32, #tpu.memory_space<vmem>>, %arg11: memref<1x8x32xbf16, #tpu.memory_space<vmem>>, %arg12: memref<1x32xf32, #tpu.memory_space<vmem>>, %arg13: memref<1x8x32xf32, #tpu.memory_space<vmem>>, %arg14: memref<1x8x32xf32, #tpu.memory_space<vmem>>) attributes {dimension_semantics = [#tpu.dimension_semantics<parallel>, #tpu.dimension_semantics<arbitrary>], iteration_bounds = array<i64: 2, 4>, scalar_prefetch = 0 : i64, scratch_operands = 1 : i64, tpu.core_type = #tpu.core_type<tc>, window_params = [{transform_indices = @transform_0, window_bounds = array<i64: 1, 8, 32>}, {transform_indices = @transform_1, window_bounds = array<i64: 1, 8, 32>}, {transform_indices = @transform_2, window_bounds = array<i64: 1, 8, 32>}, {transform_indices = @transform_3, window_bounds = array<i64: 1, 32, 8>}, {transform_indices = @transform_4, window_bounds = array<i64: 1, 1, 8>}, {transform_indices = @transform_5, window_bounds = array<i64: 1, 32, 8>}, {transform_indices = @transform_6, window_bounds = array<i64: 1, 1, 8>}, {transform_indices = @transform_7, window_bounds = array<i64: 1, 32, 8>}, {transform_indices = @transform_8, window_bounds = array<i64: 1, 1, 8>}, {transform_indices = @transform_9, window_bounds = array<i64: 1, 8, 32>}, {pipeline_mode = #tpu.pipeline_mode<synchronous>, transform_indices = @transform_10, window_bounds = array<i64: 1, 32>}, {transform_indices = @transform_11, window_bounds = array<i64: 1, 8, 32>}]} {
    %c0 = arith.constant 0 : index
    %c0_0 = arith.constant 0 : index
    %c0_1 = arith.constant 0 : index
    %0 = vector.load %arg2[%c0, %c0_0, %c0_1] : memref<1x8x32xbf16, #tpu.memory_space<vmem>>, vector<1x8x32xbf16>
    %1 = vector.shape_cast %0 : vector<1x8x32xbf16> to vector<8x32xbf16>
    %c0_2 = arith.constant 0 : index
    %c0_3 = arith.constant 0 : index
    %c0_4 = arith.constant 0 : index
    %2 = vector.load %arg3[%c0_2, %c0_3, %c0_4] : memref<1x8x32xbf16, #tpu.memory_space<vmem>>, vector<1x8x32xbf16>
    %3 = vector.shape_cast %2 : vector<1x8x32xbf16> to vector<8x32xbf16>
    %c0_5 = arith.constant 0 : index
    %c0_6 = arith.constant 0 : index
    %c0_7 = arith.constant 0 : index
    %4 = vector.load %arg4[%c0_5, %c0_6, %c0_7] : memref<1x8x32xbf16, #tpu.memory_space<vmem>>, vector<1x8x32xbf16>
    %5 = vector.shape_cast %4 : vector<1x8x32xbf16> to vector<8x32xbf16>
    %c0_8 = arith.constant 0 : index
    %c0_9 = arith.constant 0 : index
    %c0_10 = arith.constant 0 : index
    %6 = vector.load %arg5[%c0_8, %c0_9, %c0_10] : memref<1x32x8xbf16, #tpu.memory_space<vmem>>, vector<1x32x8xbf16>
    %7 = vector.shape_cast %6 : vector<1x32x8xbf16> to vector<32x8xbf16>
    %cst = arith.constant dense<0.000000e+00> : vector<8x8xf32>
    %8 = tpu.matmul %1, %7, %cst {dimension_numbers = #tpu.dot_dimension_numbers<[1], [0], [0], [1], [0, 0, 1, 1], [], []>} : vector<8x32xbf16>, vector<32x8xbf16>, vector<8x8xf32> -> vector<8x8xf32>
    %c0_11 = arith.constant 0 : index
    %c0_12 = arith.constant 0 : index
    %c0_13 = arith.constant 0 : index
    %9 = vector.load %arg6[%c0_11, %c0_12, %c0_13] : memref<1x1x8xf32, #tpu.memory_space<vmem>>, vector<1x1x8xf32>
    %10 = vector.shape_cast %9 : vector<1x1x8xf32> to vector<1x8xf32>
    %11 = vector.broadcast %10 : vector<1x8xf32> to vector<8x8xf32>
    %12 = arith.addf %8, %11 : vector<8x8xf32>
    %c0_14 = arith.constant 0 : index
    %c0_15 = arith.constant 0 : index
    %c0_16 = arith.constant 0 : index
    %13 = vector.load %arg7[%c0_14, %c0_15, %c0_16] : memref<1x32x8xbf16, #tpu.memory_space<vmem>>, vector<1x32x8xbf16>
    %14 = vector.shape_cast %13 : vector<1x32x8xbf16> to vector<32x8xbf16>
    %cst_17 = arith.constant dense<0.000000e+00> : vector<8x8xf32>
    %15 = tpu.matmul %3, %14, %cst_17 {dimension_numbers = #tpu.dot_dimension_numbers<[1], [0], [0], [1], [0, 0, 1, 1], [], []>} : vector<8x32xbf16>, vector<32x8xbf16>, vector<8x8xf32> -> vector<8x8xf32>
    %c0_18 = arith.constant 0 : index
    %c0_19 = arith.constant 0 : index
    %c0_20 = arith.constant 0 : index
    %16 = vector.load %arg8[%c0_18, %c0_19, %c0_20] : memref<1x1x8xf32, #tpu.memory_space<vmem>>, vector<1x1x8xf32>
    %17 = vector.shape_cast %16 : vector<1x1x8xf32> to vector<1x8xf32>
    %18 = vector.broadcast %17 : vector<1x8xf32> to vector<8x8xf32>
    %19 = arith.addf %15, %18 : vector<8x8xf32>
    %c0_21 = arith.constant 0 : index
    %c0_22 = arith.constant 0 : index
    %c0_23 = arith.constant 0 : index
    %20 = vector.load %arg9[%c0_21, %c0_22, %c0_23] : memref<1x32x8xbf16, #tpu.memory_space<vmem>>, vector<1x32x8xbf16>
    %21 = vector.shape_cast %20 : vector<1x32x8xbf16> to vector<32x8xbf16>
    %cst_24 = arith.constant dense<0.000000e+00> : vector<8x8xf32>
    %22 = tpu.matmul %5, %21, %cst_24 {dimension_numbers = #tpu.dot_dimension_numbers<[1], [0], [0], [1], [0, 0, 1, 1], [], []>} : vector<8x32xbf16>, vector<32x8xbf16>, vector<8x8xf32> -> vector<8x8xf32>
    %c0_25 = arith.constant 0 : index
    %c0_26 = arith.constant 0 : index
    %c0_27 = arith.constant 0 : index
    %23 = vector.load %arg10[%c0_25, %c0_26, %c0_27] : memref<1x1x8xf32, #tpu.memory_space<vmem>>, vector<1x1x8xf32>
    %24 = vector.shape_cast %23 : vector<1x1x8xf32> to vector<1x8xf32>
    %25 = vector.broadcast %24 : vector<1x8xf32> to vector<8x8xf32>
    %26 = arith.addf %22, %25 : vector<8x8xf32>
    %cst_28 = arith.constant 0.353553385 : f32
    %27 = vector.broadcast %cst_28 : f32 to vector<8x8xf32>
    %28 = arith.mulf %12, %27 : vector<8x8xf32>
    %29 = vector.shape_cast %28 : vector<8x8xf32> to vector<1x8x8xf32>
    %30 = arith.truncf %29 : vector<1x8x8xf32> to vector<1x8x8xbf16>
    %31 = vector.shape_cast %19 : vector<8x8xf32> to vector<1x8x8xf32>
    %32 = arith.truncf %31 : vector<1x8x8xf32> to vector<1x8x8xbf16>
    %33 = vector.shape_cast %26 : vector<8x8xf32> to vector<1x8x8xf32>
    %34 = arith.truncf %33 : vector<1x8x8xf32> to vector<1x8x8xbf16>
    "tpu.trace_start"() <{level = 10 : i32, message = "bqd,bkd->bqk"}> : () -> ()
    %cst_29 = arith.constant dense<0.000000e+00> : vector<1x8x8xf32>
    %35 = tpu.matmul %30, %32, %cst_29 {dimension_numbers = #tpu.dot_dimension_numbers<[2], [2], [1], [1], [0, 0, 0, 1, 1, 1], [0], [0]>} : vector<1x8x8xbf16>, vector<1x8x8xbf16>, vector<1x8x8xf32> -> vector<1x8x8xf32>
    "tpu.trace_stop"() : () -> ()
    %cst_30 = arith.constant dense<0xFF800000> : vector<1x8xf32>
    %36 = vector.multi_reduction <maximumf>, %35, %cst_30 [2] : vector<1x8x8xf32> to vector<1x8xf32>
    %37 = vector.shape_cast %36 : vector<1x8xf32> to vector<1x8x1xf32>
    %38 = vector.broadcast %37 : vector<1x8x1xf32> to vector<1x8x8xf32>
    %39 = arith.subf %35, %38 : vector<1x8x8xf32>
    %40 = math.exp %39 : vector<1x8x8xf32>
    %cst_31 = arith.constant dense<0.000000e+00> : vector<1x8xf32>
    %41 = vector.multi_reduction <add>, %40, %cst_31 [2] : vector<1x8x8xf32> to vector<1x8xf32>
    %42 = vector.shape_cast %41 : vector<1x8xf32> to vector<1x8x1xf32>
    %43 = tpu.reciprocal %42 {approx = true} : vector<1x8x1xf32> -> vector<1x8x1xf32>
    %44 = vector.broadcast %43 : vector<1x8x1xf32> to vector<1x8x8xf32>
    %45 = arith.mulf %40, %44 : vector<1x8x8xf32>
    %46 = arith.truncf %45 : vector<1x8x8xf32> to vector<1x8x8xbf16>
    "tpu.trace_start"() <{level = 10 : i32, message = "bqk,bkd->bqd"}> : () -> ()
    %cst_32 = arith.constant dense<0.000000e+00> : vector<1x8x8xf32>
    %47 = tpu.matmul %46, %34, %cst_32 {dimension_numbers = #tpu.dot_dimension_numbers<[2], [1], [1], [2], [0, 0, 0, 1, 1, 2], [0], [0]>} : vector<1x8x8xbf16>, vector<1x8x8xbf16>, vector<1x8x8xf32> -> vector<1x8x8xf32>
    "tpu.trace_stop"() : () -> ()
    %48 = vector.shape_cast %47 : vector<1x8x8xf32> to vector<8x8xf32>
    %49 = arith.truncf %48 : vector<8x8xf32> to vector<8x8xbf16>
    %c0_33 = arith.constant 0 : index
    %c0_34 = arith.constant 0 : index
    %c0_35 = arith.constant 0 : index
    %50 = vector.load %arg11[%c0_33, %c0_34, %c0_35] : memref<1x8x32xbf16, #tpu.memory_space<vmem>>, vector<1x8x32xbf16>
    %51 = vector.shape_cast %50 : vector<1x8x32xbf16> to vector<8x32xbf16>
    %cst_36 = arith.constant dense<0.000000e+00> : vector<8x32xf32>
    %52 = tpu.matmul %49, %51, %cst_36 {dimension_numbers = #tpu.dot_dimension_numbers<[1], [0], [0], [1], [0, 0, 1, 1], [], []>} : vector<8x8xbf16>, vector<8x32xbf16>, vector<8x32xf32> -> vector<8x32xf32>
    %53 = vector.shape_cast %52 : vector<8x32xf32> to vector<1x8x32xf32>
    %c0_i32 = arith.constant 0 : i32
    %54 = arith.cmpi eq, %arg1, %c0_i32 : i32
    %55 = arith.extui %54 : i1 to i32
    %c0_i32_37 = arith.constant 0 : i32
    %56 = arith.cmpi ne, %55, %c0_i32_37 : i32
    scf.if %56 {
      %cst_45 = arith.constant 0.000000e+00 : f32
      %63 = vector.broadcast %cst_45 : f32 to vector<1x8x32xf32>
      %c0_46 = arith.constant 0 : index
      %c0_47 = arith.constant 0 : index
      %c0_48 = arith.constant 0 : index
      %64 = vector.load %arg14[%c0_46, %c0_47, %c0_48] : memref<1x8x32xf32, #tpu.memory_space<vmem>>, vector<1x8x32xf32>
      tpu.vector_store %arg14[%c0_46, %c0_47, %c0_48], %63 {strides = array<i32>} : memref<1x8x32xf32, #tpu.memory_space<vmem>>, vector<1x8x32xf32>,
    } else {
    }
    %c0_38 = arith.constant 0 : index
    %c0_39 = arith.constant 0 : index
    %c0_40 = arith.constant 0 : index
    %57 = vector.load %arg14[%c0_38, %c0_39, %c0_40] : memref<1x8x32xf32, #tpu.memory_space<vmem>>, vector<1x8x32xf32>
    %58 = arith.addf %57, %53 : vector<1x8x32xf32>
    %c0_41 = arith.constant 0 : index
    %c0_42 = arith.constant 0 : index
    %c0_43 = arith.constant 0 : index
    %59 = vector.load %arg14[%c0_41, %c0_42, %c0_43] : memref<1x8x32xf32, #tpu.memory_space<vmem>>, vector<1x8x32xf32>
    tpu.vector_store %arg14[%c0_41, %c0_42, %c0_43], %58 {strides = array<i32>} : memref<1x8x32xf32, #tpu.memory_space<vmem>>, vector<1x8x32xf32>,
    %c3_i32 = arith.constant 3 : i32
    %60 = arith.cmpi eq, %arg1, %c3_i32 : i32
    %61 = arith.extui %60 : i1 to i32
    %c0_i32_44 = arith.constant 0 : i32
    %62 = arith.cmpi ne, %61, %c0_i32_44 : i32
    scf.if %62 {
      %c0_45 = arith.constant 0 : index
      %c0_46 = arith.constant 0 : index
      %c0_47 = arith.constant 0 : index
      %63 = vector.load %arg14[%c0_45, %c0_46, %c0_47] : memref<1x8x32xf32, #tpu.memory_space<vmem>>, vector<1x8x32xf32>
      %c0_48 = arith.constant 0 : index
      %c0_49 = arith.constant 0 : index
      %64 = vector.load %arg12[%c0_48, %c0_49] : memref<1x32xf32, #tpu.memory_space<vmem>>, vector<1x32xf32>
      %65 = vector.shape_cast %64 : vector<1x32xf32> to vector<1x1x32xf32>
      %66 = vector.broadcast %65 : vector<1x1x32xf32> to vector<1x8x32xf32>
      %67 = arith.addf %63, %66 : vector<1x8x32xf32>
      %c0_50 = arith.constant 0 : index
      %c0_51 = arith.constant 0 : index
      %c0_52 = arith.constant 0 : index
      %68 = vector.load %arg13[%c0_50, %c0_51, %c0_52] : memref<1x8x32xf32, #tpu.memory_space<vmem>>, vector<1x8x32xf32>
      tpu.vector_store %arg13[%c0_50, %c0_51, %c0_52], %67 {strides = array<i32>} : memref<1x8x32xf32, #tpu.memory_space<vmem>>, vector<1x8x32xf32>,
    } else {
    }
    return
  }
  func.func @transform_0(%arg0: i32, %arg1: i32) -> (i32, i32, i32) {
    %c0_i32 = arith.constant 0 : i32
    %c0_i32_0 = arith.constant 0 : i32
    %c0_i32_1 = arith.constant 0 : i32
    return %arg0, %c0_i32, %c0_i32_0 : i32, i32, i32
  }
  func.func @transform_1(%arg0: i32, %arg1: i32) -> (i32, i32, i32) {
    %c0_i32 = arith.constant 0 : i32
    %c0_i32_0 = arith.constant 0 : i32
    %c0_i32_1 = arith.constant 0 : i32
    return %arg0, %c0_i32, %c0_i32_0 : i32, i32, i32
  }
  func.func @transform_2(%arg0: i32, %arg1: i32) -> (i32, i32, i32) {
    %c0_i32 = arith.constant 0 : i32
    %c0_i32_0 = arith.constant 0 : i32
    %c0_i32_1 = arith.constant 0 : i32
    return %arg0, %c0_i32, %c0_i32_0 : i32, i32, i32
  }
  func.func @transform_3(%arg0: i32, %arg1: i32) -> (i32, i32, i32) {
    %c0_i32 = arith.constant 0 : i32
    %c0_i32_0 = arith.constant 0 : i32
    %c0_i32_1 = arith.constant 0 : i32
    return %arg1, %c0_i32, %c0_i32_0 : i32, i32, i32
  }
  func.func @transform_4(%arg0: i32, %arg1: i32) -> (i32, i32, i32) {
    %c0_i32 = arith.constant 0 : i32
    %c0_i32_0 = arith.constant 0 : i32
    %c0_i32_1 = arith.constant 0 : i32
    return %arg1, %c0_i32, %c0_i32_0 : i32, i32, i32
  }
  func.func @transform_5(%arg0: i32, %arg1: i32) -> (i32, i32, i32) {
    %c0_i32 = arith.constant 0 : i32
    %c0_i32_0 = arith.constant 0 : i32
    %c0_i32_1 = arith.constant 0 : i32
    return %arg1, %c0_i32, %c0_i32_0 : i32, i32, i32
  }
  func.func @transform_6(%arg0: i32, %arg1: i32) -> (i32, i32, i32) {
    %c0_i32 = arith.constant 0 : i32
    %c0_i32_0 = arith.constant 0 : i32
    %c0_i32_1 = arith.constant 0 : i32
    return %arg1, %c0_i32, %c0_i32_0 : i32, i32, i32
  }
  func.func @transform_7(%arg0: i32, %arg1: i32) -> (i32, i32, i32) {
    %c0_i32 = arith.constant 0 : i32
    %c0_i32_0 = arith.constant 0 : i32
    %c0_i32_1 = arith.constant 0 : i32
    return %arg1, %c0_i32, %c0_i32_0 : i32, i32, i32
  }
  func.func @transform_8(%arg0: i32, %arg1: i32) -> (i32, i32, i32) {
    %c0_i32 = arith.constant 0 : i32
    %c0_i32_0 = arith.constant 0 : i32
    %c0_i32_1 = arith.constant 0 : i32
    return %arg1, %c0_i32, %c0_i32_0 : i32, i32, i32
  }
  func.func @transform_9(%arg0: i32, %arg1: i32) -> (i32, i32, i32) {
    %c0_i32 = arith.constant 0 : i32
    %c0_i32_0 = arith.constant 0 : i32
    %c0_i32_1 = arith.constant 0 : i32
    return %arg1, %c0_i32, %c0_i32_0 : i32, i32, i32
  }
  func.func @transform_10(%arg0: i32, %arg1: i32) -> (i32, i32) {
    %c0_i32 = arith.constant 0 : i32
    %c0_i32_0 = arith.constant 0 : i32
    %c0_i32_1 = arith.constant 0 : i32
    return %c0_i32, %c0_i32_0 : i32, i32
  }
  func.func @transform_11(%arg0: i32, %arg1: i32) -> (i32, i32, i32) {
    %c0_i32 = arith.constant 0 : i32
    %c0_i32_0 = arith.constant 0 : i32
    %c0_i32_1 = arith.constant 0 : i32
    return %arg0, %c0_i32, %c0_i32_0 : i32, i32, i32
  }
}

</mosaic_0001>

<bundles_post_ra>
// kernel: tpu_custom_call.1
= control target key start
LH: loop header
LB: loop body
LE: loop exit
PB: predicated region body
PF: predicated region fallthrough
CT: control target
= control target key end

     0   :  { %s1426_s0 = inlined_call_operand.vmem [shape: bf16[2,8,32], index: 0, kind: input, shape index: {}]   ;;  %s1427_s1 = inlined_call_operand.vmem [shape: bf16[2,8,32], index: 1, kind: input, shape index: {}]   ;;  %s1428_s2 = inlined_call_operand.vmem [shape: bf16[2,8,32], index: 2, kind: input, shape index: {}]   ;;  %s1429_s3 = inlined_call_operand.vmem [shape: bf16[4,32,8], index: 3, kind: input, shape index: {}]   ;;  %s1430_s4 = inlined_call_operand.vmem [shape: f32[4,1,8], index: 4, kind: input, shape index: {}]   ;;  %s1431_s5 = inlined_call_operand.vmem [shape: bf16[4,32,8], index: 5, kind: input, shape index: {}]   ;;  %s1432_s6 = inlined_call_operand.vmem [shape: f32[4,1,8], index: 6, kind: input, shape index: {}]   ;;  %s1433_s7 = inlined_call_operand.vmem [shape: bf16[4,32,8], index: 7, kind: input, shape index: {}]   ;;  %s1434_s8 = inlined_call_operand.vmem [shape: f32[4,1,8], index: 8, kind: input, shape index: {}]   ;;  %s1435_s9 = inlined_call_operand.vmem [shape: bf16[4,8,32], index: 9, kind: input, shape index: {}]   ;;  %s1436_s10 = inlined_call_operand.vmem [shape: f32[1,32], index: 10, kind: input, shape index: {}]   ;;  %s1437_s11 = inlined_call_operand.hbm [shape: f32[2,8,32], index: 11, kind: output, shape index: {}]  }
   0x1   :  { %1445 = sst [smem:[#allocation14_spill]] %s1429_s3 }
   0x2   :  { %1446 = sst [smem:[#allocation15_spill]] %s1430_s4 }
   0x3   :  { %1447 = sst [smem:[#allocation16_spill]] %s1431_s5 }
   0x4   :  { %16 = vsyncpa [#allocation4], 0 }
   0x5   :  { %18 = vsyncpa [#allocation4 + $0x1], 0  ;;  %s1239_s17 = smov 0   ;;  %s1241_s18 = smov 0  }
   0x6   :  { %s1243_s19 = smov 0   ;;  %s1245_s20 = smov 0  }
   0x7   :  { %s1247_s21 = smov 0   ;;  %s1249_s22 = smov 0  }
   0x8   :  { %s1251_s23 = smov 0   ;;  %s1253_s24 = smov 0  }
   0x9 LB: > { %1448 = sst [smem:[#allocation6_spill]] %s1148_s17  ;;  %s941_s25 = sadd.s32 4294967295, %s1176_s24   ;;  %s1176_s24 = sphi %s1253_s24, %s24_s24   ;;  %s1172_s23 = sphi %s1251_s23, %s1469_s23   ;;  %s1168_s22 = sphi %s1249_s22, %s1468_s22   ;;  %s1164_s21 = sphi %s1247_s21, %s1467_s21   ;;  %s1160_s20 = sphi %s1245_s20, %s1466_s20   ;;  %s1156_s19 = sphi %s1243_s19, %s1465_s19   ;;  %s1152_s18 = sphi %s1241_s18, %s1471_s18   ;;  %s1148_s17 = sphi %s1239_s17, %s1470_s17  }
   0xa   : > { %1449 = sst [smem:[#allocation7_spill]] %s1156_s19  ;;  %s942_s26 = sadd.s32 4294967294, %s1176_s24  }
   0xb   : > { %1450 = sst [smem:[#allocation8_spill]] %s1168_s22  ;;  %s33_s27 = sadd.s32 1, %s1168_s22 }
   0xc   : > { %1451 = sst [smem:[#allocation9_spill]] %s1172_s23  ;;  %p34_p0 = scmp.ge.s32.totalorder %s33_s27, 4 }
   0xd   : > { %s36_s28 = sadd.s32 1, %s1172_s23  ;;  %p334_p1 = scmp.ne.s32.totalorder %s1156_s19, %s1152_s18 }
   0xe   : > { %p335_p2 = scmp.eq.s32.totalorder %s941_s25, 7  ;;  %s1473_s27 = smov (%p34_p0, %s33_s27), 0 }
   0xf   : > { %1452 = sst [smem:[#allocation10_spill]] %s1473_s27  ;;  %s1475_s28 = smov (!%p34_p0, %s36_s28), %s1172_s23 }
  0x10   : > { %p1288_p3 = por %p335_p2, %p334_p1  ;;  %p340_p4 = scmp.ne.s32.totalorder %s1152_s18, %s1148_s17 }
  0x11   : > { %p38_p5 = scmp.ge.s32.totalorder %s1475_s28, 2  ;;  %p341_p6 = scmp.eq.s32.totalorder %s942_s26, 7 }
  0x12   : > { %p945_p7 = scmp.ge.s32.totalorder %s1176_s24, 1  ;;  %p432_p8 = scmp.lt.s32.totalorder %s1176_s24, 9 }
  0x13   : > { %s1477_s28 = smov (%p38_p5, %s1475_s28), 0  ;;  %p1298_p9 = por %p341_p6, %p340_p4 }
  0x14   : > { %1454 = sst [smem:[#allocation11_spill]] %s1477_s28  ;;  %p433_p10 = pnand %p945_p7, %p432_p8 }
  0x15   : > { %s1455_s30 = scalar_select %p1298_p9, 1, 0 }
  0x16   : > { %s321_s12 = ssub.s32 %s1172_s23, %s1477_s28  ;;  %s324_s13 = sadd.s32 1, %s1156_s19 }
  0x17   : > { %1456 = sst [smem:[#allocation12_spill]] %s1455_s30  ;;  %p322_p11 = scmp.eq.s32.totalorder %s321_s12, 0 }
  0x18   : > { %436 = sbr.rel (%p433_p10) target bundleno = 872 (0x368), region = 64  ;;  %s1441_s15 = sand.u32 (!%p433_p10), 1, %s1152_s18  }
  0x19   : > { %s1306_s14 = scalar_select %p322_p11, %s1156_s19, %s324_s13  }
  0x1a   : > { %p519_p12 = scmp.lt.s32.totalorder (!%p433_p10), %s1160_s20, 3  ;;  %s1312_s16 = sshll.u32 (!%p433_p10), %s1441_s15, 3 }
  0x1b   : > { %1457 = sst [smem:[#allocation13_spill]] %s1306_s14  ;;  %p507_p13 = scmp.lt.s32.totalorder (!%p433_p10), %s1164_s21, 1 }
  0x1c   : > { %s1458_s4 = sld [smem:[#allocation15_spill]] (!%p433_p10)  ;;  %p987_p0 = scmp.ne.s32.totalorder (!%p433_p10), %s1160_s20, 0 }
  0x1d   : > { %s1316_s25 = scalar_select %p519_p12, %s1160_s20, 3  ;;  %vm571_vm0 = vcmask 261120   ;;  %vm664_vm1 = vcmask 64512   ;;  %vm699_vm2 = vcmask 1043456  }
  0x1e   : > { %s508_s26 = scalar_select %p507_p13, %s1164_s21, 1 }
  0x1f   : > { %s1320_s12 = sshll.u32 %s1316_s25, 4  ;;  %s1459_s3 = sld [smem:[#allocation14_spill]] }
  0x20   : > { %s1460_s5 = sld [smem:[#allocation16_spill]]  ;;  %s1334_s17 = sshll.u32 %s508_s26, 2 }
  0x21   : > { %s542_s13 = scalar_lea.vmem %s1434_s8, %s1316_s25 }
  0x22   : > { %s526_s27 = scalar_lea.vmem %s1458_s4, %s1316_s25  ;;  %s510_s4 = scalar_lea.vmem %s1426_s0, %s1334_s17  ;;  %v1076_v24 = vld [vmem:[%s542_s13] ss:$0 sm:$0xff] }
  0x23   : > { %v548_v4 = vld [vmem:[%s510_s4] sm:$0xf] }
  0x24   : > { %v1074_v6 = vld [vmem:[%s526_s27] ss:$0 sm:$0xff] }
  0x25   : > { %s523_s15 = scalar_lea.vmem %s1459_s3, %s1320_s12  ;;  %s514_s3 = scalar_lea.vmem %s1427_s1, %s1334_s17 }
  0x26   : > { %s531_s30 = scalar_lea.vmem %s1460_s5, %s1320_s12  ;;  %v997_v0 = vld [vmem:[%s523_s15 + $0x8] sm:$0xff]  ;;  %v996_v2 = vld [vmem:[%s523_s15] sm:$0xff]  ;;  %s534_s5 = scalar_lea.vmem %s1432_s6, %s1316_s25 }
  0x27   : > { %v999_v1 = vld [vmem:[%s531_s30 + $0x8] sm:$0xff]  ;;  %581 = vmatpush.bf16.msra.mxu0 %v997_v0  ;;  %v998_v3 = vld [vmem:[%s531_s30] sm:$0xff]  ;;  %s518_s15 = scalar_lea.vmem %s1428_s2, %s1334_s17  ;;  %s956_s17 = sshll.u32 %s1316_s25, 2 }
  0x28   : > { %617 = vmatpush.bf16.msra.mxu1 %v999_v1  ;;  %v549_v5 = vld [vmem:[%s514_s3] sm:$0xf]  ;;  %s546_s23 = scalar_lea.vmem %s1435_s9, %s956_s17  ;;  %s506_s25 = scalar_lea.vmem [#allocation3], %s1312_s16 }
  0x29   : > { %v1075_v7 = vld [vmem:[%s534_s5] ss:$0 sm:$0xff]  ;;  %s539_s5 = scalar_lea.vmem %s1433_s7, %s1320_s12 }
  0x2a   : > { %v1001_v18 = vld [vmem:[%s539_s5 + $0x8] sm:$0xff]  ;;  %v1000_v19 = vld [vmem:[%s539_s5] sm:$0xff] }
  0x2b   : > { %582 = vmatpush.bf16.msra.mxu0 %v996_v2  ;;  %653 = vmatpush.bf16.msra.mxu2 %v1001_v18  ;;  %v550_v20 = vld [vmem:[%s518_s15] sm:$0xf] }
  0x2c   : > { %618 = vmatpush.bf16.msra.mxu1 %v998_v3  ;;  %v717_v35 = vld [vmem:[%s546_s23] sm:$0xf] }
  0x2d   : > { %v722_v36 = vsel %vm699_vm2, %v717_v35, 0 }
  0x2e   : > { %965 = vmatmul.msk.bf16.vlgmr.msra.gmra.mxu0 %vm571_vm0, %v548_v4 }
  0x2f   : > { %974 = vmatmul.msk.bf16.vlgmr.msra.gmra.mxu1 %vm571_vm0, %v549_v5  ;;  %654 = vmatpush.bf16.msra.mxu2 %v1000_v19 }
  0x30   : > { %731 = vmatpush.bf16.msrb.mxu1 %v722_v36 }
  0x32   : > { %983 = vmatmul.msk.bf16.vlgmr.msra.gmra.mxu2 %vm571_vm0, %v550_v20 }
  0xab   : > { %v584_v8 = vpop.f32.mrf.mxu0 }
  0xac   : > { %v620_v9 = vpop.f32.mrf.mxu1  ;;  %v585_v10 = vadd.f32 %v1074_v6, %v584_v8 }
  0xad   : > { %v621_v11 = vadd.f32 %v1075_v7, %v620_v9 }
  0xae   : > { %v660_v13 = vmul.f32 0.35355338, %v585_v10 }
  0xaf   : > { %v662_v12 = vpack.c.bf16 %v621_v11, %v621_v11 }
  0xb0   : > { %v661_v17 = vpack.c.bf16 %v660_v13, %v660_v13 }
  0xb1   : > { %v669_v14 = vsel %vm664_vm1, %v662_v12, 0 }
  0xb2   : > { %678 = vmatpush.bf16.xpose.msra.mxu3 %v669_v14 }
  0xb3   : > { %v586_v15 = vpop.f32.mrf.mxu0 }
  0xb4   : > { %v622_v16 = vpop.f32.mrf.mxu1 }
  0xb5   : > { %v656_v25 = vpop.f32.mrf.mxu2 }
  0xb6   : > { %v657_v27 = vadd.f32 %v1076_v24, %v656_v25 }
  0xb8   : > { %v663_v29 = vpack.c.bf16 %v657_v27, %v657_v27 }
  0xb9   : > { %984 = vmatmul.msk.bf16.vlgmr.msra.gmra.mxu3 %vm664_vm1, %v661_v17 }
  0xba   : > { %v701_v31 = vsel %vm699_vm2, %v663_v29, 0 }
  0xbb   : > { %710 = vmatpush.bf16.msrb.mxu0 %v701_v31 }
  0xbd   : > { %v658_v32 = vpop.f32.mrf.mxu2 }
 0x13c   : > { %v680_v21 = vpop.f32.mrf.mxu3 }
 0x13d   : > { %v684_v22 = vsel %vm664_vm1, %v680_v21, -inf }
 0x13e   : > { %685 = vmax.xlane.f32.xlu0 %v684_v22 }
 0x144   : > { %v682_v23 = vpop.f32.mrf.mxu3 }
 0x1b1   : > { %v686_v26 = vpop.xlane.xlu0 %685 }
 0x1b2   : > { %v687_v28 = vsub.f32 %v680_v21, %v686_v26 }
 0x1b4   : > { %v688_v30 = vmul.f32 1.442695, %v687_v28 }
 0x1b6   : > { %1077 = vpow2.f32 %v688_v30 }
 0x1bc   : > { %v1078_v33 = vpop.eup %1077 }
 0x1bd   : > { %v690_v34 = vsel %vm664_vm1, %v1078_v33, 0.0 }
 0x1be   : > { %691 = vadd.xlane.f32.xlu0 %v690_v34 }
 0x231   : > { %v692_v37 = vpop.xlane.xlu0 %691 }
 0x232   : > { %1079 = vrcp.f32 %v692_v37 }
 0x238   : > { %v1080_v38 = vpop.eup %1079 }
 0x239   : > { %v694_v39 = vmul.f32 %v1080_v38, %v1078_v33 }
 0x23b   : > { %v695_v40 = vpack.c.bf16 %v694_v39, %v694_v39 }
 0x23d   : > { %985 = vmatmul.msk.bf16.vlgmr.msrb.gmra.mxu0 %vm664_vm1, %v695_v40 }
 0x2ba   : > { %v712_v41 = vpop.f32.mrf.mxu0 }
 0x2bb   : > { %v716_v42 = vpack.c.bf16 %v712_v41, %v712_v41 }
 0x2bd   : > { %986 = vmatmul.msk.bf16.vlgmr.msrb.gmra.mxu1 %vm664_vm1, %v716_v42 }
 0x2c2   : > { %v714_v43 = vpop.f32.mrf.mxu0 }
 0x33a   : > { %v733_v44 = vpop.f32.mrf.mxu1 }
 0x33e   : > { %740 = sbr.rel (%p987_p0) target bundleno = 837 (0x345), region = 68 }
 0x342   : > { %v735_v45 = vpop.f32.mrf.mxu1 }
 0x343   : > { %v1178_v46 = vmov 0.0  }
 0x344   : > { %741 = vst.msk [vmem:[#allocation2] sm:$0xff] %vm571_vm0, %v1178_v46 }
 0x345 PF: > { %p988_p1 = scmp.ne.s32.totalorder %s1160_s20, 3 }
 0x34a   : > { %748 = sbr.rel (%p988_p1) target bundleno = 857 (0x359), region = 72 }
 0x34b   : > { %v742_v47 = vld [vmem:[#allocation2] sm:$0xff] }
 0x34c   : > { %v743_v48 = vadd.f32 %v742_v47, %v733_v44 }
 0x34e   : > { %744 = vst.msk [vmem:[#allocation2] sm:$0xff] %vm571_vm0, %v743_v48 }
 0x34f   : > { %v1081_v50 = vld [vmem:[%s1436_s10] ss:$0 sm:$0xff] }
 0x355   : > { %v749_v49 = vld [vmem:[#allocation2] sm:$0xff] }
 0x356   : > { %v754_v51 = vadd.f32 %v1081_v50, %v749_v49 }
 0x358   : > { %755 = vst.msk [vmem:[%s506_s25] sm:$0xff] %vm571_vm0, %v754_v51 }
 0x359 PF: > { %s990_s16 = sshll.u32 %s1164_s21, 3  ;;  %s769_s27 = sshll.u32 %s506_s25, 4  ;;  %s770_s27 = int_to_ptr.vmem [resolvable:$true] %s769_s27 }
 0x35a   : > { %s767_s5 = scalar_lea.hbm %s1437_s11, %s990_s16  ;;  %s1461_s30 = sand.u32 1, %s1152_s18  }
 0x35b   : > { %s771_s20 = sshll.u32 %s767_s5, 4  ;;  %s757_s15 = scalar_lea.sflag [#allocation4], %s1461_s30  ;;  %s772_s20 = int_to_ptr.hbm [resolvable:$true] %s771_s20 }
 0x35c   : > { %s1096_s26 = sshra.s32 %s772_s20, 4  ;;  %s1102_s21 = scalar_lea.hbm %s1437_s11, 16  ;;  %s1097_s26 = int_to_ptr.hbm [resolvable:$true] %s1096_s26 }
 0x35d   : > { %s1098_s28 = scalar_lea.hbm %s1097_s26, 8  ;;  %p1103_p6 = scmp.lt.s32.totalorder %s1097_s26, %s1437_s11 }
 0x35e   : > { %p1099_p2 = scmp.ne.s32.totalorder %s1097_s26, %s1098_s28  ;;  %p1104_p7 = scmp.lt.s32.totalorder %s1102_s21, %s1098_s28 }
 0x360   : > { %p1100_p4 = pnand %p1099_p2, %p1288_p3  ;;  %p1105_p8 = por %p1104_p7, %p1103_p6 }
 0x362   : > { %p1101_p5 = pneg %p1100_p4 }
 0x364   : > { %p1106_p10 = pnand %p1105_p8, %p1101_p5 }
 0x366   : > { %1109 = shalt.err (!%p1106_p10)
}
 0x367   : > { %1002 = dma.vmem_to_hbm [thread:$0]  (%p1288_p3), %s770_s27, 128, %s772_s20, %s757_s15  }
 0x368 PF: > { %s1462_s23 = sld [smem:[#allocation6_spill]]  ;;  %p1008_p11 = scmp.ge.s32.totalorder %s1176_s24, 2 }
 0x36a   : > { %p1005_p12 = pnand %p1008_p11, %p1298_p9 }
 0x36c   : > { %p1006_p13 = pneg %p1005_p12 }
 0x36e   : > { %s783_s19 = sand.u32 1, %s1462_s23  }
 0x36f   : > { %s784_s14 = scalar_lea.sflag [#allocation4], %s783_s19 }
 0x370   : > { %1143 = dma.done.wait (%p1006_p13), %s784_s14, 128  }
 0x371   : > { %1145 = vsyncadd (%p1006_p13), %s784_s14, 4294967168  ;;  %s24_s24 = sadd.s32 1, %s1176_s24   ;;  %s1464_s16 = sld [smem:[#allocation7_spill]] }
 0x372   : > { %p21_p0 = scmp.ge.s32.totalorder %s24_s24, 10   ;;  %s1465_s19 = sld [smem:[#allocation13_spill]] }
 0x373   : > { %s1466_s20 = sld [smem:[#allocation8_spill]]  ;;  %s1470_s17 = smov %s1152_s18 }
 0x374   : > { %s1467_s21 = sld [smem:[#allocation9_spill]]  ;;  %23 = sbr.rel (!%p21_p0) target bundleno = 9 (0x9), region = 134 }
 0x375   : > { %s1468_s22 = sld [smem:[#allocation10_spill]] }
 0x376   : > { %s1469_s23 = sld [smem:[#allocation11_spill]] }
 0x377   : > { %s1471_s18 = smov %s1464_s16 }
 0x379   :  { %790 = vsyncpa [#allocation4], 1 }
 0x37a   :  { %792 = vsyncpa [#allocation4 + $0x1], 1 }

</bundles_post_ra>
